<compile_context>
chip_gen: v5e
topology: v5e:2x2
jax: 0.10.0
libtpu: 0.0.40
codegen_flags: <defaults>
</compile_context>

<pallas_src>
import functools

import jax
import jax.numpy as jnp
from jax.experimental import pallas as pl
from jax.experimental.pallas import tpu as pltpu


# --------------------------------------------------------------------------- kernels
def _fused_residual_kernel(x_ref, w_ref, b_ref, o_ref, *, n_out: int, mxu_bf16: bool):
    """out[:, :n_out] = relu(X @ W + b); out[:, n_out:] = X (fused concat)."""
    x = x_ref[...]                                                   # (TILE_B, n_in)
    xm = x.astype(jnp.bfloat16) if mxu_bf16 else x
    y = jnp.dot(xm, w_ref[...], preferred_element_type=jnp.float32)  # MXU
    y = jnp.maximum(y + b_ref[...], 0.0)                             # bias + ReLU (VPU)
    o_ref[:, :n_out] = y.astype(o_ref.dtype)
    o_ref[:, n_out:] = x.astype(o_ref.dtype)                         # residual slab


def _linear_relu_ktiled_kernel(x_ref, w_ref, b_ref, y_ref, acc_ref, *, mxu_bf16: bool):
    """K-tiled y = relu(X @ W + b); W streamed over the (last, 'arbitrary') K grid axis."""
    k = pl.program_id(1)

    @pl.when(k == 0)
    def _():
        acc_ref[...] = jnp.zeros_like(acc_ref)

    x = x_ref[...]
    xm = x.astype(jnp.bfloat16) if mxu_bf16 else x
    acc_ref[...] += jnp.dot(xm, w_ref[...], preferred_element_type=jnp.float32)

    @pl.when(k == pl.num_programs(1) - 1)
    def _():
        y_ref[...] = jnp.maximum(acc_ref[...] + b_ref[...], 0.0).astype(y_ref.dtype)


# --------------------------------------------------------------------------- helpers
def _round_up(x: int, m: int) -> int:
    return ((x + m - 1) // m) * m


def _round_down(x: int, m: int) -> int:
    return (x // m) * m


def _resident_spec(shape, index_map):
    """BlockSpec for a grid-invariant block: single-buffered (no pointless double buffer)."""
    try:
        return pl.BlockSpec(shape, index_map, pipeline_mode=pl.Buffered(1))
    except Exception:  # older jax without pipeline_mode -> default double-buffering
        return pl.BlockSpec(shape, index_map)


def _vmem_budget_and_limit() -> tuple[int, int]:
    """Generation-aware VMEM budget (for tiling) and explicit scoped-VMEM limit."""
    try:
        cap = int(pltpu.get_tpu_info().vmem_capacity_bytes)   # 128 MiB v5e/v6e, 64 MiB v7x
    except Exception:
        cap = 64 * 1024 * 1024                                # conservative (v7x-sized)
    budget = int(cap * 0.60)          # what the tiling heuristic may consume
    limit = int(cap * 0.75)           # explicit limit handed to Mosaic (headroom above budget)
    return budget, limit


def _choose_tile_b(batch: int, n_in: int, n_out: int, w_itemsize: int, budget: int):
    """Largest MXU/DMA-friendly batch tile fitting the budget with a fully-resident W.

    Returns None if even the single-buffered W does not fit -> use the K-tiled path."""
    out_w = n_in + n_out
    # 2x double-buffered X block + 2x double-buffered fused output block (f32).
    per_row = 4 * (2 * n_in + 2 * out_w)
    # Single-buffered W + bias (constant block index).
    fixed = w_itemsize * n_in * n_out + 4 * n_out
    avail = budget - fixed
    if avail < per_row * 8:
        return None
    cap = avail // per_row
    if cap >= 256:
        cap = _round_down(cap, 256)   # MXU-friendly (2x256^2 on v6e/v7x)
    elif cap >= 128:
        cap = 128
    else:
        cap = max(8, _round_down(cap, 8))
    if batch <= cap:
        if batch >= 256:
            # Keep >=2 (ideally ~4) grid steps so DMA/compute overlap and the v7x megacore
            # can shard the 'parallel' batch axis across its 2 TensorCores.
            return min(batch, max(128, _round_up(pl.cdiv(batch, 4), 128)))
        return batch
    return cap


def _choose_k_tiles(batch: int, n_in: int, n_out: int, w_itemsize: int, budget: int,
                    tile_k: int | None):
    """Tile sizes for the K-tiled (wide n_in) path: keep tile_b large, stream W over K."""
    if tile_k is None:
        tile_k = min(512, _round_up(n_in, 128))
    # Per-row bytes: 2x X block + 2x y block + f32 accumulator scratch.
    per_row = 4 * (2 * tile_k + 2 * n_out + n_out)
    # Double-buffered W blocks (streamed over K) + single-buffered bias.
    fixed = 2 * tile_k * n_out * w_itemsize + 4 * n_out
    avail = max(budget - fixed, per_row * 8)
    cap = max(8, _round_down(avail // per_row, 8))
    if cap >= 256:
        cap = _round_down(cap, 256)
    elif cap >= 128:
        cap = 128
    tile_b = batch if batch <= cap else cap
    return tile_b, tile_k


# --------------------------------------------------------------------------- wrapper
def residual_layer(
    x: jax.Array,
    weight: jax.Array,
    bias: jax.Array,
    *,
    weight_is_transposed: bool = False,   # pass W already as (n_in, n_out) to skip the HBM transpose
    use_pallas: bool | None = None,
    mxu_bf16: bool = False,               # bf16 MXU operands, f32 accumulation (numerics change)
    out_dtype=jnp.float32,
    tile_b: int | None = None,
    tile_k: int | None = None,            # force the K-tiled path with this K tile
) -> jax.Array:
    """x: (..., n_in); weight: (n_out, n_in) torch layout (or (n_in, n_out) if transposed)."""
    if weight_is_transposed:
        n_in_w, n_out = weight.shape
    else:
        n_out, n_in_w = weight.shape
    lead = x.shape[:-1]

    if x.shape[-1] == 0:
        # ResidualLayer.forward explicitly special-cases an empty feature dim.
        return jnp.zeros((*lead, n_out), dtype=out_dtype)

    assert x.shape[-1] == n_in_w, "feature dim mismatch"
    n_in = n_in_w

    x2d = x.reshape(-1, n_in).astype(jnp.float32)
    batch = x2d.shape[0]
    b2d = bias.reshape(1, n_out).astype(jnp.float32)

    if use_pallas is None:
        # Tiny problems are dominated by pallas_call dispatch overhead -> plain fused XLA.
        use_pallas = batch * n_in * n_out >= (1 << 16)

    if not use_pallas:
        w_f32 = (weight if weight_is_transposed else weight.T).astype(jnp.float32)
        y = jnp.maximum(x2d @ w_f32 + b2d, 0.0)
        out2d = jnp.concatenate([y, x2d], axis=-1).astype(out_dtype)
        return out2d.reshape(*lead, n_out + n_in)

    mxu_dtype = jnp.bfloat16 if mxu_bf16 else jnp.float32
    # NOTE: for hot-path use, pre-store the weight in (n_in, n_out) layout / target dtype and
    # pass weight_is_transposed=True so this transpose/cast is not an extra HBM pass per call.
    w_t = (weight if weight_is_transposed else weight.T).astype(mxu_dtype)  # (n_in, n_out)
    w_itemsize = jnp.dtype(mxu_dtype).itemsize

    budget, vmem_limit = _vmem_budget_and_limit()

    use_k_path = tile_k is not None
    if not use_k_path:
        if tile_b is None:
            tile_b = _choose_tile_b(batch, n_in, n_out, w_itemsize, budget)
        if tile_b is None:             # full W does not fit in the VMEM budget
            use_k_path = True

    # ---------------- fused single-K path (common case) ----------------
    if not use_k_path:
        assert tile_b == batch or tile_b % 8 == 0, "tile_b must be a multiple of 8"
        out_w = n_out + n_in
        grid = (pl.cdiv(batch, tile_b),)
        out2d = pl.pallas_call(
            functools.partial(_fused_residual_kernel, n_out=n_out, mxu_bf16=mxu_bf16),
            out_shape=jax.ShapeDtypeStruct((batch, out_w), out_dtype),
            grid=grid,
            in_specs=[
                pl.BlockSpec((tile_b, n_in), lambda i: (i, 0)),      # X: tiled over batch
                _resident_spec((n_in, n_out), lambda i: (0, 0)),     # W: VMEM-resident, 1-buffered
                _resident_spec((1, n_out), lambda i: (0, 0)),        # b: VMEM-resident, 1-buffered
            ],
            out_specs=pl.BlockSpec((tile_b, out_w), lambda i: (i, 0)),
            compiler_params=pltpu.CompilerParams(
                dimension_semantics=("parallel",),
                vmem_limit_bytes=vmem_limit),
            cost_estimate=pl.CostEstimate(
                flops=2 * batch * n_in * n_out,
                transcendentals=0,
                bytes_accessed=4 * (batch * n_in + batch * out_w + n_out)
                               + w_t.size * w_itemsize),
        )(x2d, w_t, b2d)
        return out2d.reshape(*lead, out_w)

    # ---------------- K-tiled path (wide n_in) ----------------
    tile_b_k, tile_k = _choose_k_tiles(batch, n_in, n_out, w_itemsize, budget, tile_k)
    if tile_b is None:
        tile_b = tile_b_k
    assert tile_b == batch or tile_b % 8 == 0, "tile_b must be a multiple of 8"

    n_in_pad = _round_up(n_in, tile_k)
    if n_in_pad != n_in:
        # Zero-pad K so every K block is full (padded W rows are zero -> result unchanged).
        x_k = jnp.pad(x2d, ((0, 0), (0, n_in_pad - n_in)))
        w_k = jnp.pad(w_t, ((0, n_in_pad - n_in), (0, 0)))
    else:
        x_k, w_k = x2d, w_t

    grid = (pl.cdiv(batch, tile_b), n_in_pad // tile_k)
    y2d = pl.pallas_call(
        functools.partial(_linear_relu_ktiled_kernel, mxu_bf16=mxu_bf16),
        out_shape=jax.ShapeDtypeStruct((batch, n_out), jnp.float32),
        grid=grid,
        in_specs=[
            pl.BlockSpec((tile_b, tile_k), lambda i, k: (i, k)),     # X: tiled over batch & K
            pl.BlockSpec((tile_k, n_out), lambda i, k: (k, 0)),      # W: streamed over K
            _resident_spec((1, n_out), lambda i, k: (0, 0)),         # b: resident, 1-buffered
        ],
        out_specs=pl.BlockSpec((tile_b, n_out), lambda i, k: (i, 0)),
        scratch_shapes=[pltpu.VMEM((tile_b, n_out), jnp.float32)],   # f32 accumulator
        compiler_params=pltpu.CompilerParams(
            dimension_semantics=("parallel", "arbitrary"),
            vmem_limit_bytes=vmem_limit),
        cost_estimate=pl.CostEstimate(
            flops=2 * batch * n_in_pad * n_out,
            transcendentals=0,
            bytes_accessed=4 * (batch * n_in_pad + batch * n_out + n_out)
                           + w_k.size * w_itemsize),
    )(x_k, w_k, b2d)
    # TODO(synk): fuse the residual X writeback into the K-tiled kernel (per-K-step slab
    # stores into a (n_out + n_in)-wide output) instead of this wrapper-side concat.
    out2d = jnp.concatenate([y2d, x2d], axis=-1).astype(out_dtype)
    return out2d.reshape(*lead, n_out + n_in)


# --------------------------------------------------------------------------- demo
if __name__ == "__main__":
    key = jax.random.PRNGKey(0)

    def make_params(k, n_in, n_out):
        kw, kb = jax.random.split(k)
        bound = 1.0 / max(n_in, 1) ** 0.5
        w = jax.random.uniform(kw, (n_out, n_in), minval=-bound, maxval=bound,
                               dtype=jnp.float32)
        b = jax.random.uniform(kb, (n_out,), minval=-bound, maxval=bound,
                               dtype=jnp.float32)
        return w, b

    def reference(x, w, b):
        y = jnp.maximum(
            jnp.dot(x.astype(jnp.float32), w.T,
                    precision=jax.lax.Precision.HIGHEST) + b, 0.0)
        return jnp.concatenate([y, x.astype(jnp.float32)], axis=-1)

    k1, k2, k3, k4, k5, k6 = jax.random.split(key, 6)

    # Case 1: 128-wide features, batch 256 -> fused-concat kernel, >=2 grid steps.
    n_in, n_out, batch = 128, 128, 256
    x = jax.random.normal(k1, (batch, n_in), dtype=jnp.float32)
    w, b = make_params(k2, n_in, n_out)
    out = jax.block_until_ready(residual_layer(x, w, b, use_pallas=True))
    assert out.shape == (batch, n_out + n_in)
    assert jnp.allclose(out, reference(x, w, b), atol=2e-3, rtol=2e-3)

    # Case 2: non-128-aligned n_out -> still fused (masked edge store), forced Pallas.
    n_in, n_out, batch = 32, 48, 64
    x = jax.random.normal(k3, (batch, n_in), dtype=jnp.float32)
    w, b = make_params(k4, n_in, n_out)
    out = jax.block_until_ready(residual_layer(x, w, b, use_pallas=True, tile_b=32))
    assert out.shape == (batch, n_out + n_in)
    assert jnp.allclose(out, reference(x, w, b), atol=2e-3, rtol=2e-3)

    # Case 3: K-tiled (wide-n_in) path forced via tile_k, with extra leading dims.
    n_in, n_out = 256, 128
    x = jax.random.normal(k5, (2, 64, n_in), dtype=jnp.float32)
    w, b = make_params(k6, n_in, n_out)
    out = jax.block_until_ready(
        residual_layer(x, w, b, use_pallas=True, tile_k=128, tile_b=64))
    assert out.shape == (2, 64, n_out + n_in)
    assert jnp.allclose(out, reference(x.reshape(-1, n_in), w, b).reshape(2, 64, -1),
                        atol=2e-3, rtol=2e-3)

    # Case 4: empty feature dim (module's explicit special case).
    x_empty = jnp.zeros((4, 3, 0), dtype=jnp.float32)
    out_empty = jax.block_until_ready(residual_layer(x_empty, w, b))
    assert out_empty.shape == (4, 3, n_out)
    assert jnp.all(out_empty == 0.0)

    print("KERNEL_OK")
</pallas_src>

<mosaic_0001>
module attributes {stable_mosaic.version = 11 : i64} {
  func.func @_fused_residual_kernel(%arg0: i32, %arg1: memref<128x128xf32, #tpu.memory_space<vmem>>, %arg2: memref<128x128xf32, #tpu.memory_space<vmem>>, %arg3: memref<1x128xf32, #tpu.memory_space<vmem>>, %arg4: memref<128x256xf32, #tpu.memory_space<vmem>>) attributes {dimension_semantics = [#tpu.dimension_semantics<parallel>], iteration_bounds = array<i64: 2>, scalar_prefetch = 0 : i64, scratch_operands = 0 : i64, tpu.core_type = #tpu.core_type<tc>, window_params = [{transform_indices = @transform_0, window_bounds = array<i64: 128, 128>}, {pipeline_mode = #tpu.pipeline_mode<synchronous>, transform_indices = @transform_1, window_bounds = array<i64: 128, 128>}, {pipeline_mode = #tpu.pipeline_mode<synchronous>, transform_indices = @transform_2, window_bounds = array<i64: 1, 128>}, {transform_indices = @transform_3, window_bounds = array<i64: 128, 256>}]} {
    %c0 = arith.constant 0 : index
    %c0_0 = arith.constant 0 : index
    %0 = vector.load %arg1[%c0, %c0_0] : memref<128x128xf32, #tpu.memory_space<vmem>>, vector<128x128xf32>
    %c0_1 = arith.constant 0 : index
    %c0_2 = arith.constant 0 : index
    %1 = vector.load %arg2[%c0_1, %c0_2] : memref<128x128xf32, #tpu.memory_space<vmem>>, vector<128x128xf32>
    %cst = arith.constant dense<0.000000e+00> : vector<128x128xf32>
    %2 = tpu.matmul %0, %1, %cst {dimension_numbers = #tpu.dot_dimension_numbers<[1], [0], [0], [1], [0, 0, 1, 1], [], []>} : vector<128x128xf32>, vector<128x128xf32>, vector<128x128xf32> -> vector<128x128xf32>
    %c0_3 = arith.constant 0 : index
    %c0_4 = arith.constant 0 : index
    %3 = vector.load %arg3[%c0_3, %c0_4] : memref<1x128xf32, #tpu.memory_space<vmem>>, vector<1x128xf32>
    %4 = vector.broadcast %3 : vector<1x128xf32> to vector<128x128xf32>
    %5 = arith.addf %2, %4 : vector<128x128xf32>
    %cst_5 = arith.constant 0.000000e+00 : f32
    %6 = vector.broadcast %cst_5 : f32 to vector<128x128xf32>
    %7 = arith.maximumf %5, %6 : vector<128x128xf32>
    %c0_6 = arith.constant 0 : index
    %c0_7 = arith.constant 0 : index
    %8 = vector.load %arg4[%c0_6, %c0_7] : memref<128x256xf32, #tpu.memory_space<vmem>>, vector<128x128xf32>
    tpu.vector_store %arg4[%c0_6, %c0_7], %7 {strides = array<i32>} : memref<128x256xf32, #tpu.memory_space<vmem>>, vector<128x128xf32>,
    %c0_8 = arith.constant 0 : index
    %c128 = arith.constant 128 : index
    %9 = vector.load %arg4[%c0_8, %c128] : memref<128x256xf32, #tpu.memory_space<vmem>>, vector<128x128xf32>
    tpu.vector_store %arg4[%c0_8, %c128], %0 {strides = array<i32>} : memref<128x256xf32, #tpu.memory_space<vmem>>, vector<128x128xf32>,
    return
  }
  func.func @transform_0(%arg0: i32) -> (i32, i32) {
    %c0_i32 = arith.constant 0 : i32
    %c0_i32_0 = arith.constant 0 : i32
    return %arg0, %c0_i32 : i32, i32
  }
  func.func @transform_1(%arg0: i32) -> (i32, i32) {
    %c0_i32 = arith.constant 0 : i32
    %c0_i32_0 = arith.constant 0 : i32
    %c0_i32_1 = arith.constant 0 : i32
    return %c0_i32, %c0_i32_0 : i32, i32
  }
  func.func @transform_2(%arg0: i32) -> (i32, i32) {
    %c0_i32 = arith.constant 0 : i32
    %c0_i32_0 = arith.constant 0 : i32
    %c0_i32_1 = arith.constant 0 : i32
    return %c0_i32, %c0_i32_0 : i32, i32
  }
  func.func @transform_3(%arg0: i32) -> (i32, i32) {
    %c0_i32 = arith.constant 0 : i32
    %c0_i32_0 = arith.constant 0 : i32
    return %arg0, %c0_i32 : i32, i32
  }
}

</mosaic_0001>

<bundles_post_ra>
// kernel: tpu_custom_call.1
= control target key start
LH: loop header
LB: loop body
LE: loop exit
PB: predicated region body
PF: predicated region fallthrough
CT: control target
= control target key end

     0   :  { %8 = vsyncpa [#allocation3], 0  ;;  %s1005_s0 = inlined_call_operand.hbm [shape: f32[256,128], index: 0, kind: input, shape index: {}]   ;;  %s1006_s1 = inlined_call_operand.hbm [shape: f32[128,128], index: 1, kind: input, shape index: {}]   ;;  %s1007_s2 = inlined_call_operand.vmem [shape: f32[1,128], index: 2, kind: input, shape index: {}]   ;;  %s1008_s3 = inlined_call_operand.hbm [shape: f32[256,256], index: 3, kind: output, shape index: {}]  }
   0x1   :  { %10 = vsyncpa [#allocation3 + $0x1], 0 }
   0x2   :  { %11 = vsyncpa [#allocation6], 0 }
   0x3   :  { %12 = vsyncpa [#allocation4], 0 }
   0x4   :  { %14 = vsyncpa [#allocation4 + $0x1], 0  ;;  %s746_s12 = smov 0   ;;  %s748_s13 = smov 0  }
   0x5   :  { %s750_s14 = smov 0   ;;  %s752_s15 = smov 0  }
   0x6 LB: > { %s767_s16 = sadd.s32 4294967295, %s719_s15   ;;  %s459_s17 = sadd.s32 4294967294, %s719_s15   ;;  %s719_s15 = sphi %s752_s15, %s1018_s15   ;;  %s715_s14 = sphi %s750_s14, %s1017_s14   ;;  %s711_s13 = sphi %s748_s13, %s1016_s13   ;;  %s707_s12 = sphi %s746_s12, %s1015_s12  }
   0x7   : > { %p40_p0 = scmp.ne.s32.totalorder %s711_s13, %s707_s12  ;;  %p41_p1 = scmp.eq.s32.totalorder %s767_s16, 0 }
   0x8   : > { %p106_p2 = scmp.eq.s32.totalorder %s767_s16, 1  ;;  %p112_p3 = scmp.eq.s32.totalorder %s459_s17, 1 }
   0x9   : > { %p776_p4 = por %p41_p1, %p40_p0  ;;  %p460_p5 = scmp.ge.s32.totalorder %s719_s15, 1 }
   0xa   : > { %p781_p6 = por %p112_p3, %p40_p0  ;;  %p119_p7 = scmp.lt.s32.totalorder %s719_s15, 3 }
   0xb   : > { %s130_s22 = sshll.u32 %s1006_s1, 4  ;;  %s721_s24 = smov [#allocation5]   ;;  %s131_s22 = int_to_ptr.hbm [resolvable:$true] %s130_s22 }
   0xc   : > { %p789_p8 = pnand %p460_p5, %p119_p7  ;;  %s132_s25 = sshll.u32 %s721_s24, 4  ;;  %s133_s25 = int_to_ptr.vmem [resolvable:$true] %s132_s25 }
   0xd   : > { %s799_s26 = sadd.s32 1, %s719_s15   ;;  %s722_s27 = smov 128  }
   0xe   : > { %p535_p9 = pneg %p789_p8  ;;  %s723_s28 = smov 8  }
   0xf   : > { %s24_s29 = ssub.s32 %s719_s15, %s799_s26  ;;  %s27_s30 = sadd.s32 1, %s715_s14 }
  0x10   : > { %p536_p10 = pnand %p535_p9, %p41_p1  ;;  %p25_p12 = scmp.eq.s32.totalorder %s24_s29, 0 }
  0x11   : > { %p34_p13 = scmp.ne.s32.totalorder %s715_s14, %s711_s13  ;;  %p35_p0 = scmp.eq.s32.totalorder %s719_s15, 0 }
  0x12   : > { %538 = dma.hbm_to_vmem [thread:$0]  (!%p536_p10), %s131_s22, 2048, %s133_s25, [#allocation6], %s722_s27, %s722_s27, %s723_s28  }
  0x13   : > { %s811_s4 = scalar_select %p25_p12, %s715_s14, %s27_s30  }
  0x14   : > { %p815_p3 = por %p106_p2, %p34_p13  ;;  %p548_p5 = scmp.lt.s32.totalorder %s719_s15, 2 }
  0x15   : > { %s149_s6 = sand.u32 1, %s715_s14   ;;  %s476_s7 = sshll.u32 %s719_s15, 7 }
  0x16   : > { %p36_p7 = por %p35_p0, %p34_p13  ;;  %s463_s8 = sshll.u32 %s149_s6, 7 }
  0x17   : > { %s158_s11 = scalar_lea.hbm %s1005_s0, %s476_s7  ;;  %s153_s20 = scalar_lea.vmem [#allocation2], %s463_s8 }
  0x18   : > { %s159_s17 = sshll.u32 %s158_s11, 4  ;;  %s161_s21 = sshll.u32 %s153_s20, 4  ;;  %s160_s17 = int_to_ptr.hbm [resolvable:$true] %s159_s17  ;;  %s162_s21 = int_to_ptr.vmem [resolvable:$true] %s161_s21 }
  0x19   : > { %p825_p9 = pnand %p548_p5, %p36_p7  ;;  %s150_s24 = scalar_lea.sflag [#allocation3], %s149_s6 }
  0x1a   : > { %s619_s25 = sshra.s32 %s160_s17, 4  ;;  %s626_s8 = scalar_lea.hbm %s1005_s0, 256  ;;  %s620_s25 = int_to_ptr.hbm [resolvable:$true] %s619_s25 }
  0x1b   : > { %s621_s29 = scalar_lea.hbm %s620_s25, 128  ;;  %p623_p10 = pneg %p825_p9 }
  0x1c   : > { %p622_p2 = scmp.ne.s32.totalorder %s620_s25, %s621_s29  ;;  %p627_p0 = scmp.lt.s32.totalorder %s620_s25, %s1005_s0 }
  0x1d   : > { %p628_p5 = scmp.lt.s32.totalorder %s626_s8, %s621_s29 }
  0x1e   : > { %p624_p12 = pnand %p623_p10, %p622_p2 }
  0x1f   : > { %p629_p7 = por %p628_p5, %p627_p0 }
  0x20   : > { %p625_p13 = pneg %p624_p12 }
  0x22   : > { %p630_p11 = pnand %p629_p7, %p625_p13 }
  0x24   : > { %633 = shalt.err (!%p630_p11)
}
  0x25   : > { %542 = dma.hbm_to_vmem [thread:$0]  (!%p825_p9), %s160_s17, 2048, %s162_s21, %s150_s24, %s722_s27, %s722_s27, %s723_s28  }
  0x26   : > { %173 = sbr.rel (%p789_p8) target bundleno = 243 (0xf3), region = 32  ;;  %s845_s6 = sand.u32 (!%p789_p8), 1, %s711_s13  }
  0x27   : > { %s467_s11 = sshll.u32 (!%p789_p8), %s845_s6, 7  ;;  %s176_s20 = scalar_lea.sflag (!%p789_p8), [#allocation3], %s845_s6 }
  0x28   : > { %s849_s25 = scalar_lea.vmem (!%p789_p8), [#allocation2], %s467_s11 }
  0x2b   : > { %694 = dma.done.wait (%p776_p4), %s176_s20, 2048  }
  0x2c   : > { %696 = vsyncadd (%p776_p4), %s176_s20, 4294965248 }
  0x2d   : > { %698 = dma.done.wait (%p41_p1), [#allocation6], 2048  }
  0x2e   : > { %700 = vsyncadd (%p41_p1), [#allocation6], 4294965248  ;;  %v241_v0 = vld [vmem:[#allocation5 + $0x78] sm:$0xff]  ;;  %v240_v1 = vld [vmem:[#allocation5 + $0x70] sm:$0xff]  ;;  %s469_s23 = sshll.u32 %s845_s6, 8  ;;  %s478_s17 = sshll.u32 %s767_s16, 8 }
  0x2f   : > { %480 = vmatpush.msra.mxu2 %v241_v0  ;;  %481 = vmatpush.msra.mxu3 %v241_v0  ;;  %v239_v2 = vld [vmem:[#allocation5 + $0x68] sm:$0xff]  ;;  %v238_v3 = vld [vmem:[#allocation5 + $0x60] sm:$0xff]  ;;  %v237_v5 = vld [vmem:[#allocation5 + $0x58] sm:$0xff]  ;;  %s863_s18 = scalar_lea.vmem [#allocation7], %s469_s23  ;;  %s372_s24 = scalar_lea.hbm %s1008_s3, %s478_s17 }
  0x30   : > { %246 = vmatpush.msra.mxu0 %v241_v0  ;;  %479 = vmatpush.msra.mxu1 %v241_v0  ;;  %v861_v4 = vld [vmem:[%s849_s25 + $0x40] sm:$0xff]  ;;  %v236_v8 = vld [vmem:[#allocation5 + $0x50] sm:$0xff]  ;;  %v883_v10 = vld [vmem:[%s849_s25 + $0x48] sm:$0xff]  ;;  %s373_s16 = sshll.u32 %s863_s18, 4  ;;  %s375_s29 = sshll.u32 %s372_s24, 4  ;;  %s374_s16 = int_to_ptr.vmem [resolvable:$true] %s373_s16  ;;  %s376_s29 = int_to_ptr.hbm [resolvable:$true] %s375_s29 }
  0x31   : > { %483 = vmatpush.msra.mxu2 %v240_v1  ;;  %484 = vmatpush.msra.mxu3 %v240_v1  ;;  %351 = vst [vmem:[%s863_s18 + $0x88] sm:$0xff] %v861_v4  ;;  %v868_v6 = vld [vmem:[%s849_s25 + $0x60] sm:$0xff]  ;;  %v235_v11 = vld [vmem:[#allocation5 + $0x48] sm:$0xff]  ;;  %v903_v16 = vld [vmem:[%s849_s25 + $0x50] sm:$0xff]  ;;  %s360_s30 = scalar_lea.sflag [#allocation4], %s845_s6  ;;  %s663_s7 = sshra.s32 %s376_s29, 4  ;;  %s664_s7 = int_to_ptr.hbm [resolvable:$true] %s663_s7 }
  0x32   : > { %247 = vmatpush.msra.mxu0 %v240_v1  ;;  %482 = vmatpush.msra.mxu1 %v240_v1  ;;  %355 = vst [vmem:[%s863_s18 + $0xc8] sm:$0xff] %v868_v6  ;;  %v873_v7 = vld [vmem:[%s849_s25] sm:$0xff]  ;;  %v888_v12 = vld [vmem:[%s849_s25 + $0x68] sm:$0xff]  ;;  %v233_v17 = vld [vmem:[#allocation5 + $0x38] sm:$0xff]  ;;  %s665_s8 = scalar_lea.hbm %s664_s7, 256  ;;  %s669_s11 = scalar_lea.hbm %s1008_s3, 512 }
  0x33   : > { %486 = vmatpush.msra.mxu2 %v239_v2  ;;  %487 = vmatpush.msra.mxu3 %v239_v2  ;;  %343 = vst [vmem:[%s863_s18 + $0x8] sm:$0xff] %v873_v7  ;;  %v878_v9 = vld [vmem:[%s849_s25 + $0x20] sm:$0xff]  ;;  %v893_v13 = vld [vmem:[%s849_s25 + $0x8] sm:$0xff]  ;;  %v908_v18 = vld [vmem:[%s849_s25 + $0x70] sm:$0xff]  ;;  %p666_p1 = scmp.ne.s32.totalorder %s664_s7, %s665_s8  ;;  %p670_p11 = scmp.lt.s32.totalorder %s664_s7, %s1008_s3 }
  0x34   : > { %248 = vmatpush.msra.mxu0 %v239_v2  ;;  %485 = vmatpush.msra.mxu1 %v239_v2  ;;  %347 = vst [vmem:[%s863_s18 + $0x48] sm:$0xff] %v878_v9  ;;  %v234_v14 = vld [vmem:[#allocation5 + $0x40] sm:$0xff]  ;;  %v898_v15 = vld [vmem:[%s849_s25 + $0x28] sm:$0xff]  ;;  %v232_v19 = vld [vmem:[#allocation5 + $0x30] sm:$0xff]  ;;  %p671_p9 = scmp.lt.s32.totalorder %s669_s11, %s665_s8 }
  0x35   : > { %489 = vmatpush.msra.mxu2 %v238_v3  ;;  %490 = vmatpush.msra.mxu3 %v238_v3  ;;  %352 = vst [vmem:[%s863_s18 + $0x98] sm:$0xff] %v883_v10  ;;  %v212_v20 = vld [vmem:[%s849_s25 + $0x10] sm:$0xff]  ;;  %v231_v21 = vld [vmem:[#allocation5 + $0x28] sm:$0xff]  ;;  %v221_v23 = vld [vmem:[%s849_s25 + $0x58] sm:$0xff]  ;;  %p667_p4 = pnand %p666_p1, %p815_p3 }
  0x36   : > { %249 = vmatpush.msra.mxu0 %v238_v3  ;;  %488 = vmatpush.msra.mxu1 %v238_v3  ;;  %356 = vst [vmem:[%s863_s18 + $0xd8] sm:$0xff] %v888_v12  ;;  %v216_v22 = vld [vmem:[%s849_s25 + $0x30] sm:$0xff]  ;;  %v230_v24 = vld [vmem:[#allocation5 + $0x20] sm:$0xff]  ;;  %v229_v25 = vld [vmem:[#allocation5 + $0x18] sm:$0xff]  ;;  %p672_p2 = por %p671_p9, %p670_p11 }
  0x37   : > { %492 = vmatpush.msra.mxu2 %v237_v5  ;;  %493 = vmatpush.msra.mxu3 %v237_v5  ;;  %344 = vst [vmem:[%s863_s18 + $0x18] sm:$0xff] %v893_v13  ;;  %v225_v26 = vld [vmem:[%s849_s25 + $0x78] sm:$0xff]  ;;  %v228_v27 = vld [vmem:[#allocation5 + $0x10] sm:$0xff]  ;;  %v227_v29 = vld [vmem:[#allocation5 + $0x8] sm:$0xff]  ;;  %p668_p8 = pneg %p667_p4 }
  0x38   : > { %250 = vmatpush.msra.mxu0 %v237_v5  ;;  %491 = vmatpush.msra.mxu1 %v237_v5  ;;  %348 = vst [vmem:[%s863_s18 + $0x58] sm:$0xff] %v898_v15  ;;  %v213_v28 = vld [vmem:[%s849_s25 + $0x18] sm:$0xff]  ;;  %v226_v31 = vld [vmem:[#allocation5] sm:$0xff] }
  0x39   : > { %495 = vmatpush.msra.mxu2 %v236_v8  ;;  %496 = vmatpush.msra.mxu3 %v236_v8  ;;  %353 = vst [vmem:[%s863_s18 + $0xa8] sm:$0xff] %v903_v16  ;;  %v217_v30 = vld [vmem:[%s849_s25 + $0x38] sm:$0xff]  ;;  %v937_v32 = vld [vmem:[%s1007_s2] ss:$0 sm:$0xff]  ;;  %p673_p10 = pnand %p672_p2, %p668_p8 }
  0x3a   : > { %251 = vmatpush.msra.mxu0 %v236_v8  ;;  %494 = vmatpush.msra.mxu1 %v236_v8  ;;  %357 = vst [vmem:[%s863_s18 + $0xe8] sm:$0xff] %v908_v18 }
  0x3b   : > { %498 = vmatpush.msra.mxu2 %v235_v11  ;;  %499 = vmatpush.msra.mxu3 %v235_v11  ;;  %345 = vst [vmem:[%s863_s18 + $0x28] sm:$0xff] %v212_v20 }
  0x3c   : > { %252 = vmatpush.msra.mxu0 %v235_v11  ;;  %497 = vmatpush.msra.mxu1 %v235_v11  ;;  %349 = vst [vmem:[%s863_s18 + $0x68] sm:$0xff] %v216_v22 }
  0x3d   : > { %501 = vmatpush.msra.mxu2 %v234_v14  ;;  %502 = vmatpush.msra.mxu3 %v234_v14  ;;  %354 = vst [vmem:[%s863_s18 + $0xb8] sm:$0xff] %v221_v23 }
  0x3e   : > { %253 = vmatpush.msra.mxu0 %v234_v14  ;;  %500 = vmatpush.msra.mxu1 %v234_v14  ;;  %358 = vst [vmem:[%s863_s18 + $0xf8] sm:$0xff] %v225_v26 }
  0x3f   : > { %504 = vmatpush.msra.mxu2 %v233_v17  ;;  %505 = vmatpush.msra.mxu3 %v233_v17  ;;  %346 = vst [vmem:[%s863_s18 + $0x38] sm:$0xff] %v213_v28 }
  0x40   : > { %254 = vmatpush.msra.mxu0 %v233_v17  ;;  %503 = vmatpush.msra.mxu1 %v233_v17  ;;  %350 = vst [vmem:[%s863_s18 + $0x78] sm:$0xff] %v217_v30 }
  0x41   : > { %507 = vmatpush.msra.mxu2 %v232_v19  ;;  %508 = vmatpush.msra.mxu3 %v232_v19 }
  0x42   : > { %255 = vmatpush.msra.mxu0 %v232_v19  ;;  %506 = vmatpush.msra.mxu1 %v232_v19 }
  0x43   : > { %510 = vmatpush.msra.mxu2 %v231_v21  ;;  %511 = vmatpush.msra.mxu3 %v231_v21 }
  0x44   : > { %256 = vmatpush.msra.mxu0 %v231_v21  ;;  %509 = vmatpush.msra.mxu1 %v231_v21 }
  0x45   : > { %513 = vmatpush.msra.mxu2 %v230_v24  ;;  %514 = vmatpush.msra.mxu3 %v230_v24 }
  0x46   : > { %257 = vmatpush.msra.mxu0 %v230_v24  ;;  %512 = vmatpush.msra.mxu1 %v230_v24 }
  0x47   : > { %516 = vmatpush.msra.mxu2 %v229_v25  ;;  %517 = vmatpush.msra.mxu3 %v229_v25 }
  0x48   : > { %258 = vmatpush.msra.mxu0 %v229_v25  ;;  %515 = vmatpush.msra.mxu1 %v229_v25 }
  0x49   : > { %519 = vmatpush.msra.mxu2 %v228_v27  ;;  %520 = vmatpush.msra.mxu3 %v228_v27 }
  0x4a   : > { %259 = vmatpush.msra.mxu0 %v228_v27  ;;  %518 = vmatpush.msra.mxu1 %v228_v27 }
  0x4b   : > { %522 = vmatpush.msra.mxu2 %v227_v29  ;;  %523 = vmatpush.msra.mxu3 %v227_v29 }
  0x4c   : > { %260 = vmatpush.msra.mxu0 %v227_v29  ;;  %521 = vmatpush.msra.mxu1 %v227_v29 }
  0x4d   : > { %525 = vmatpush.msra.mxu2 %v226_v31  ;;  %526 = vmatpush.msra.mxu3 %v226_v31 }
  0x4e   : > { %286 = vmatmul.f32.vlgmr.msra.gmra.mxu2 %v861_v4  ;;  %298 = vmatmul.f32.vlgmr.msra.gmra.mxu3 %v868_v6 }
  0x4f   : > { %261 = vmatpush.msra.mxu0 %v226_v31  ;;  %524 = vmatpush.msra.mxu1 %v226_v31 }
  0x50   : > { %262 = vmatmul.f32.vlgmr.msra.gmra.mxu0 %v873_v7  ;;  %274 = vmatmul.f32.vlgmr.msra.gmra.mxu1 %v878_v9 }
  0x56   : > { %289 = vmatmul.f32.gmra.mxu2 %v883_v10  ;;  %301 = vmatmul.f32.gmra.mxu3 %v888_v12 }
  0x58   : > { %265 = vmatmul.f32.gmra.mxu0 %v893_v13  ;;  %277 = vmatmul.f32.gmra.mxu1 %v898_v15 }
  0x5e   : > { %292 = vmatmul.f32.gmra.mxu2 %v903_v16  ;;  %304 = vmatmul.f32.gmra.mxu3 %v908_v18 }
  0x60   : > { %268 = vmatmul.f32.gmra.mxu0 %v212_v20  ;;  %280 = vmatmul.f32.gmra.mxu1 %v216_v22 }
  0x66   : > { %295 = vmatmul.f32.gmra.mxu2 %v221_v23  ;;  %307 = vmatmul.f32.gmra.mxu3 %v225_v26 }
  0x68   : > { %271 = vmatmul.f32.gmra.mxu0 %v213_v28  ;;  %283 = vmatmul.f32.gmra.mxu1 %v217_v30 }
  0xcd   : > { %v263_v33 = vpop.f32.mrf.mxu0  ;;  %v275_v34 = vpop.f32.mrf.mxu1 }
  0xce   : > { %v264_v35 = vadd.f32 %v937_v32, %v263_v33  ;;  %v276_v36 = vadd.f32 %v937_v32, %v275_v34 }
  0xd0   : > { %v311_v37 = vmax.f32 %v264_v35, 0.0  ;;  %v315_v38 = vmax.f32 %v276_v36, 0.0 }
  0xd1   : > { %v287_v39 = vpop.f32.mrf.mxu2  ;;  %v299_v40 = vpop.f32.mrf.mxu3 }
  0xd2   : > { %327 = vst [vmem:[%s863_s18] sm:$0xff] %v311_v37  ;;  %v288_v41 = vadd.f32 %v937_v32, %v287_v39  ;;  %v300_v42 = vadd.f32 %v937_v32, %v299_v40 }
  0xd3   : > { %331 = vst [vmem:[%s863_s18 + $0x40] sm:$0xff] %v315_v38 }
  0xd4   : > { %v319_v43 = vmax.f32 %v288_v41, 0.0  ;;  %v323_v44 = vmax.f32 %v300_v42, 0.0 }
  0xd5   : > { %v266_v45 = vpop.f32.mrf.mxu0  ;;  %v278_v46 = vpop.f32.mrf.mxu1 }
  0xd6   : > { %335 = vst [vmem:[%s863_s18 + $0x80] sm:$0xff] %v319_v43  ;;  %v267_v47 = vadd.f32 %v937_v32, %v266_v45  ;;  %v279_v48 = vadd.f32 %v937_v32, %v278_v46 }
  0xd7   : > { %339 = vst [vmem:[%s863_s18 + $0xc0] sm:$0xff] %v323_v44 }
  0xd8   : > { %v312_v49 = vmax.f32 %v267_v47, 0.0  ;;  %v316_v50 = vmax.f32 %v279_v48, 0.0 }
  0xd9   : > { %v290_v51 = vpop.f32.mrf.mxu2  ;;  %v302_v52 = vpop.f32.mrf.mxu3 }
  0xda   : > { %328 = vst [vmem:[%s863_s18 + $0x10] sm:$0xff] %v312_v49  ;;  %v291_v53 = vadd.f32 %v937_v32, %v290_v51  ;;  %v303_v54 = vadd.f32 %v937_v32, %v302_v52 }
  0xdb   : > { %332 = vst [vmem:[%s863_s18 + $0x50] sm:$0xff] %v316_v50 }
  0xdc   : > { %v320_v55 = vmax.f32 %v291_v53, 0.0  ;;  %v324_v56 = vmax.f32 %v303_v54, 0.0 }
  0xdd   : > { %v269_v57 = vpop.f32.mrf.mxu0  ;;  %v281_v58 = vpop.f32.mrf.mxu1 }
  0xde   : > { %336 = vst [vmem:[%s863_s18 + $0x90] sm:$0xff] %v320_v55  ;;  %v270_v59 = vadd.f32 %v937_v32, %v269_v57  ;;  %v282_v60 = vadd.f32 %v937_v32, %v281_v58 }
  0xdf   : > { %340 = vst [vmem:[%s863_s18 + $0xd0] sm:$0xff] %v324_v56 }
  0xe0   : > { %v313_v61 = vmax.f32 %v270_v59, 0.0  ;;  %v317_v62 = vmax.f32 %v282_v60, 0.0 }
  0xe1   : > { %v293_v63 = vpop.f32.mrf.mxu2  ;;  %v305_v0 = vpop.f32.mrf.mxu3 }
  0xe2   : > { %329 = vst [vmem:[%s863_s18 + $0x20] sm:$0xff] %v313_v61  ;;  %v294_v1 = vadd.f32 %v937_v32, %v293_v63  ;;  %v306_v2 = vadd.f32 %v937_v32, %v305_v0 }
  0xe3   : > { %333 = vst [vmem:[%s863_s18 + $0x60] sm:$0xff] %v317_v62 }
  0xe4   : > { %v321_v3 = vmax.f32 %v294_v1, 0.0  ;;  %v325_v4 = vmax.f32 %v306_v2, 0.0 }
  0xe5   : > { %v272_v5 = vpop.f32.mrf.mxu0  ;;  %v284_v6 = vpop.f32.mrf.mxu1 }
  0xe6   : > { %337 = vst [vmem:[%s863_s18 + $0xa0] sm:$0xff] %v321_v3  ;;  %v273_v7 = vadd.f32 %v937_v32, %v272_v5  ;;  %v285_v8 = vadd.f32 %v937_v32, %v284_v6 }
  0xe7   : > { %341 = vst [vmem:[%s863_s18 + $0xe0] sm:$0xff] %v325_v4 }
  0xe8   : > { %v314_v9 = vmax.f32 %v273_v7, 0.0  ;;  %v318_v10 = vmax.f32 %v285_v8, 0.0 }
  0xe9   : > { %v296_v11 = vpop.f32.mrf.mxu2  ;;  %v308_v12 = vpop.f32.mrf.mxu3 }
  0xea   : > { %330 = vst [vmem:[%s863_s18 + $0x30] sm:$0xff] %v314_v9  ;;  %v297_v13 = vadd.f32 %v937_v32, %v296_v11  ;;  %v309_v14 = vadd.f32 %v937_v32, %v308_v12 }
  0xeb   : > { %334 = vst [vmem:[%s863_s18 + $0x70] sm:$0xff] %v318_v10 }
  0xec   : > { %v322_v15 = vmax.f32 %v297_v13, 0.0  ;;  %v326_v16 = vmax.f32 %v309_v14, 0.0 }
  0xee   : > { %338 = vst [vmem:[%s863_s18 + $0xb0] sm:$0xff] %v322_v15 }
  0xef   : > { %342 = vst [vmem:[%s863_s18 + $0xf0] sm:$0xff] %v326_v16 }
  0xf0   : > { %676 = shalt.err (!%p673_p10)
}
  0xf1   : > { %s724_s6 = smov 256   ;;  %s725_s23 = smov 16  }
  0xf2   : > { %533 = dma.vmem_to_hbm [thread:$0]  (%p815_p3), %s374_s16, 4096, %s376_s29, %s360_s30, %s724_s6, %s724_s6, %s725_s23  }
  0xf3 PF: > { %s390_s18 = sand.u32 1, %s707_s12   ;;  %p1014_p12 = scmp.ge.s32.totalorder %s719_s15, 2 }
  0xf4   : > { %s391_s27 = scalar_lea.sflag [#allocation4], %s390_s18 }
  0xf5   : > { %p544_p13 = pnand %p1014_p12, %p781_p6 }
  0xf7   : > { %p545_p0 = pneg %p544_p13 }
  0xf9   : > { %702 = dma.done.wait (%p545_p0), %s391_s27, 4096  }
  0xfa   : > { %704 = vsyncadd (%p545_p0), %s391_s27, 4294963200  ;;  %p17_p5 = scmp.ge.s32.totalorder %s799_s26, 4   ;;  %s1015_s12 = smov %s711_s13 }
  0xfb   : > { %s1016_s13 = smov %s715_s14  ;;  %s1017_s14 = smov %s811_s4 }
  0xfc   : > { %s1018_s15 = smov %s799_s26  ;;  %19 = sbr.rel (!%p17_p5) target bundleno = 6 (0x6), region = 81 }
 0x101   :  { %397 = vsyncpa [#allocation3], 1 }
 0x102   :  { %399 = vsyncpa [#allocation3 + $0x1], 1 }
 0x103   :  { %400 = vsyncpa [#allocation6], 1 }
 0x104   :  { %401 = vsyncpa [#allocation4], 1 }
 0x105   :  { %403 = vsyncpa [#allocation4 + $0x1], 1 }

</bundles_post_ra>
